<compile_context>
chip_gen: v6e
topology: v6e:2x2x1
jax: 0.10.0
libtpu: 0.0.40
codegen_flags: <defaults>
</compile_context>

<pallas_src>
import functools

import jax
import jax.numpy as jnp
from jax.experimental import pallas as pl
from jax.experimental.pallas import tpu as pltpu


def _patch_encoder_kernel(
    x_ref,
    wpre_ref, bpre_ref,
    w1a_ref, b1a_ref, w2a_ref, b2a_ref,
    w1b_ref, b1b_ref, w2b_ref, b2b_ref,
    wpost_ref, bpost_ref,
    o_ref,
):
    f32 = jnp.float32
    cdt = wpre_ref.dtype   # matmul-operand dtype (bf16 or f32)
    mid = b1a_ref.dtype    # bottleneck accumulate / elementwise dtype

    x = x_ref[...]

    # pre_layers: Linear(in_dim, res_ch); residual carry h stays f32.
    h = jnp.dot(x, wpre_ref[...], preferred_element_type=f32) + bpre_ref[...]

    def res_block(h, w1, b1, w2, b2):
        # LinearResBlock: x + W2(relu(W1(relu(x))))
        t = jnp.maximum(h, 0.0).astype(cdt)
        # Bottleneck matmul accumulates straight into `mid` (bf16 on v6e/v7x):
        # the MXU down-cast is free in the result path and the following
        # bias+ReLU run packed on the VPU with no explicit cast pass.
        t = jnp.dot(t, w1[...], preferred_element_type=mid) + b1[...]
        t = jnp.maximum(t, 0.0).astype(cdt)
        # Expand matmul back to f32 so the residual add keeps full precision.
        t = jnp.dot(t, w2[...], preferred_element_type=f32) + b2[...]
        return h + t

    h = res_block(h, w1a_ref, b1a_ref, w2a_ref, b2a_ref)
    h = res_block(h, w1b_ref, b1b_ref, w2b_ref, b2b_ref)

    # post_layers: ReLU -> Linear(res_ch, out_ch) -> ReLU
    t = jnp.maximum(h, 0.0).astype(cdt)
    t = jnp.dot(t, wpost_ref[...], preferred_element_type=f32) + bpost_ref[...]
    o_ref[...] = jnp.maximum(t, 0.0).astype(o_ref.dtype)


def patch_encoder2_forward(x, params, *, stride, tm=2048, use_bf16=True,
                           bf16_bottleneck=None, out_dtype=jnp.float32):
    """x: [B, C, H, W] float32 (NCHW, like the PyTorch module).

    use_bf16:        bf16 matmul operands (f32 accumulation except bottleneck).
    bf16_bottleneck: accumulate the bottleneck (w1) matmuls in bf16 and keep the
                     following bias/ReLU in bf16.  Default: follow use_bf16.
                     Set False on v5e (no packed bf16 VALU there).
    out_dtype:       kernel store dtype (bf16 halves output HBM bytes; the
                     returned NCHW tensor is always f32).
    """
    B, C, H, W = x.shape
    s = stride
    assert H % s == 0 and W % s == 0
    oh, ow = H // s, W // s
    n_tokens = B * oh * ow
    in_dim = C * s * s

    cdt = jnp.bfloat16 if use_bf16 else jnp.float32
    if bf16_bottleneck is None:
        bf16_bottleneck = use_bf16
    mid_dt = jnp.bfloat16 if (use_bf16 and bf16_bottleneck) else jnp.float32

    # unfold(kernel=stride, stride=stride) + permute(0,2,1): tokens in
    # (b, oh, ow) order, features flattened as (c, kh, kw).  Under jit the
    # transpose + cast fuse into a single HBM pass over the input.
    xt = x.reshape(B, C, oh, s, ow, s)
    xt = jnp.transpose(xt, (0, 2, 4, 1, 3, 5))          # [B, oh, ow, C, s, s]
    tokens = xt.reshape(n_tokens, in_dim).astype(cdt)

    res_ch = params["w_pre"].shape[1]
    hidden = params["w1_0"].shape[1]
    out_ch = params["w_post"].shape[1]

    LANE = 128
    SUB = 16   # sublane multiple friendly to both f32 and packed bf16 layouts
    rup = lambda v, m: -(-v // m) * m
    res_ch_p = rup(res_ch, LANE)
    hidden_p = rup(hidden, LANE)
    out_ch_p = rup(out_ch, LANE)

    # Zero-pad weights/biases to lane-dense (multiple-of-128) feature dims.
    # Padded columns/rows stay exactly zero through the whole network
    # (relies on ReLU(0)=0 and no cross-feature reductions).
    def padw(w, rows, cols):
        return jnp.pad(w, ((0, rows - w.shape[0]), (0, cols - w.shape[1]))).astype(cdt)

    def padb(b, cols, dtype=jnp.float32):
        return jnp.pad(b, ((0, 0), (0, cols - b.shape[1]))).astype(dtype)

    w_pre = padw(params["w_pre"], in_dim, res_ch_p)
    b_pre = padb(params["b_pre"], res_ch_p)
    w1_0 = padw(params["w1_0"], res_ch_p, hidden_p)
    b1_0 = padb(params["b1_0"], hidden_p, mid_dt)
    w2_0 = padw(params["w2_0"], hidden_p, res_ch_p)
    b2_0 = padb(params["b2_0"], res_ch_p)
    w1_1 = padw(params["w1_1"], res_ch_p, hidden_p)
    b1_1 = padb(params["b1_1"], hidden_p, mid_dt)
    w2_1 = padw(params["w2_1"], hidden_p, res_ch_p)
    b2_1 = padb(params["b2_1"], res_ch_p)
    w_post = padw(params["w_post"], res_ch_p, out_ch_p)
    b_post = padb(params["b_post"], out_ch_p)

    # Token tile sizing (no host-side row padding of the token matrix):
    #  - never larger than the token count (no oversized blocks),
    #  - multiple of SUB (except the trivial single full-extent block),
    #  - capped so the parallel grid has >= 2 steps when tokens allow it
    #    (keeps both v7x TensorCores busy),
    #  - large otherwise, to fill the MXU and amortize per-step overhead.
    if n_tokens <= SUB:
        tm_eff = n_tokens                       # single full-extent block
    else:
        tm_req = rup(min(int(tm), n_tokens), SUB)
        two_step_cap = rup(pl.cdiv(n_tokens, 2), SUB)
        floor_cap = (n_tokens // SUB) * SUB     # keep block <= array rows
        tm_eff = max(SUB, min(tm_req, two_step_cap, floor_cap))
    grid = (pl.cdiv(n_tokens, tm_eff),)

    full = lambda *shape: pl.BlockSpec(shape, lambda i: (0,) * len(shape))

    # Advisory cost estimate so XLA schedules the surrounding layout ops well.
    n_comp = grid[0] * tm_eff
    flops = 2 * n_comp * (
        in_dim * res_ch_p
        + 2 * (res_ch_p * hidden_p + hidden_p * res_ch_p)
        + res_ch_p * out_ch_p
    )
    weight_bytes = sum(
        int(a.size) * a.dtype.itemsize
        for a in (w_pre, w1_0, w2_0, w1_1, w2_1, w_post,
                  b_pre, b1_0, b2_0, b1_1, b2_1, b_post)
    )
    bytes_accessed = (n_tokens * in_dim * tokens.dtype.itemsize
                      + n_tokens * out_ch_p * jnp.dtype(out_dtype).itemsize
                      + weight_bytes)
    cost = pl.CostEstimate(flops=flops, transcendentals=0,
                           bytes_accessed=bytes_accessed)

    out = pl.pallas_call(
        _patch_encoder_kernel,
        out_shape=jax.ShapeDtypeStruct((n_tokens, out_ch_p), out_dtype),
        grid_spec=pltpu.PrefetchScalarGridSpec(
            num_scalar_prefetch=0,
            grid=grid,
            in_specs=[
                pl.BlockSpec((tm_eff, in_dim), lambda i: (i, 0)),
                full(in_dim, res_ch_p), full(1, res_ch_p),
                full(res_ch_p, hidden_p), full(1, hidden_p),
                full(hidden_p, res_ch_p), full(1, res_ch_p),
                full(res_ch_p, hidden_p), full(1, hidden_p),
                full(hidden_p, res_ch_p), full(1, res_ch_p),
                full(res_ch_p, out_ch_p), full(1, out_ch_p),
            ],
            out_specs=pl.BlockSpec((tm_eff, out_ch_p), lambda i: (i, 0)),
        ),
        compiler_params=pltpu.CompilerParams(
            dimension_semantics=("parallel",),
            vmem_limit_bytes=48 * 1024 * 1024,
        ),
        cost_estimate=cost,
    )(
        tokens,
        w_pre, b_pre,
        w1_0, b1_0, w2_0, b2_0,
        w1_1, b1_1, w2_1, b2_1,
        w_post, b_post,
    )

    # Post glue (slice pad lanes + fold(kernel=1) to NCHW) fuses into one pass.
    out = out[:, :out_ch].reshape(B, oh, ow, out_ch)
    return jnp.transpose(out, (0, 3, 1, 2)).astype(jnp.float32)


def _ref_forward(x, params, *, stride):
    """Pure-JAX f32 reference of the PyTorch forward."""
    B, C, H, W = x.shape
    s = stride
    oh, ow = H // s, W // s
    xt = x.reshape(B, C, oh, s, ow, s)
    xt = jnp.transpose(xt, (0, 2, 4, 1, 3, 5)).reshape(B, oh * ow, C * s * s)

    def lin(a, w, b):
        return jnp.dot(a, w, preferred_element_type=jnp.float32) + b

    h = lin(xt, params["w_pre"], params["b_pre"])
    for i in range(2):
        t = jnp.maximum(h, 0.0)
        t = lin(t, params[f"w1_{i}"], params[f"b1_{i}"])
        t = jnp.maximum(t, 0.0)
        t = lin(t, params[f"w2_{i}"], params[f"b2_{i}"])
        h = h + t
    t = jnp.maximum(h, 0.0)
    t = lin(t, params["w_post"], params["b_post"])
    t = jnp.maximum(t, 0.0)
    t = t.reshape(B, oh, ow, -1)
    return jnp.transpose(t, (0, 3, 1, 2))


def make_params(key, *, in_ch, res_ch, out_ch, stride, res_block_bottleneck=2):
    """Deterministic Linear params, stored as (fan_in, fan_out) + (1, fan_out)."""
    in_dim = in_ch * stride * stride
    hidden = res_ch // res_block_bottleneck

    def linear(k, fan_in, fan_out):
        kw, kb = jax.random.split(k)
        bound = 1.0 / jnp.sqrt(fan_in)
        w = jax.random.uniform(kw, (fan_in, fan_out), jnp.float32, -bound, bound)
        b = jax.random.uniform(kb, (1, fan_out), jnp.float32, -bound, bound)
        return w, b

    keys = jax.random.split(key, 6)
    params = {}
    params["w_pre"], params["b_pre"] = linear(keys[0], in_dim, res_ch)
    params["w1_0"], params["b1_0"] = linear(keys[1], res_ch, hidden)
    params["w2_0"], params["b2_0"] = linear(keys[2], hidden, res_ch)
    params["w1_1"], params["b1_1"] = linear(keys[3], res_ch, hidden)
    params["w2_1"], params["b2_1"] = linear(keys[4], hidden, res_ch)
    params["w_post"], params["b_post"] = linear(keys[5], res_ch, out_ch)
    return params


if __name__ == "__main__":
    # Module-default-ish config: in_ch=3, stride=8, res_ch=64, out_ch=32,
    # num_res_block=2, bottleneck=2.
    in_ch, res_ch, out_ch, stride = 3, 64, 32, 8

    key = jax.random.PRNGKey(0)
    kx1, kx2, kp = jax.random.split(key, 3)
    params = make_params(kp, in_ch=in_ch, res_ch=res_ch, out_ch=out_ch,
                         stride=stride)

    fwd_f32 = jax.jit(functools.partial(
        patch_encoder2_forward, stride=stride, use_bf16=False))

    # --- 1) f32 path, tiny exact-fit config: tight correctness gate ---
    x1 = jax.random.normal(kx1, (2, in_ch, 16, 16), jnp.float32)
    out1 = jax.block_until_ready(fwd_f32(x1, params))
    ref1 = _ref_forward(x1, params, stride=stride)
    assert out1.shape == (2, out_ch, 2, 2), out1.shape
    assert jnp.allclose(out1, ref1, atol=1e-4, rtol=1e-4), \
        "f32 kernel mismatch vs reference (tiny config)"

    # --- 2) f32 path, 2-step grid with a ragged last block (no token pad) ---
    x2 = jax.random.normal(kx2, (3, in_ch, 32, 32), jnp.float32)
    out2 = jax.block_until_ready(fwd_f32(x2, params))
    ref2 = _ref_forward(x2, params, stride=stride)
    assert out2.shape == (3, out_ch, 4, 4), out2.shape
    assert jnp.allclose(out2, ref2, atol=1e-4, rtol=1e-4), \
        "f32 kernel mismatch vs reference (ragged config)"

    # --- 3) bf16 perf path (bf16 operands, bf16 bottleneck accumulate,
    #        bf16 kernel store); loose check vs the f32 reference ---
    fwd_bf16 = jax.jit(functools.partial(
        patch_encoder2_forward, stride=stride, use_bf16=True,
        out_dtype=jnp.bfloat16))
    out3 = jax.block_until_ready(fwd_bf16(x2, params))
    assert out3.shape == (3, out_ch, 4, 4) and out3.dtype == jnp.float32
    assert jnp.allclose(out3, ref2, atol=5e-2, rtol=5e-2), \
        "bf16 kernel diverged too far from f32 reference"

    print("KERNEL_OK")
</pallas_src>

<mosaic_0001>
module attributes {stable_mosaic.version = 11 : i64} {
  func.func @_patch_encoder_kernel(%arg0: i32, %arg1: memref<8x192xf32, #tpu.memory_space<vmem>>, %arg2: memref<192x128xf32, #tpu.memory_space<vmem>>, %arg3: memref<1x128xf32, #tpu.memory_space<vmem>>, %arg4: memref<128x128xf32, #tpu.memory_space<vmem>>, %arg5: memref<1x128xf32, #tpu.memory_space<vmem>>, %arg6: memref<128x128xf32, #tpu.memory_space<vmem>>, %arg7: memref<1x128xf32, #tpu.memory_space<vmem>>, %arg8: memref<128x128xf32, #tpu.memory_space<vmem>>, %arg9: memref<1x128xf32, #tpu.memory_space<vmem>>, %arg10: memref<128x128xf32, #tpu.memory_space<vmem>>, %arg11: memref<1x128xf32, #tpu.memory_space<vmem>>, %arg12: memref<128x128xf32, #tpu.memory_space<vmem>>, %arg13: memref<1x128xf32, #tpu.memory_space<vmem>>, %arg14: memref<8x128xf32, #tpu.memory_space<vmem>>) attributes {dimension_semantics = [#tpu.dimension_semantics<parallel>], iteration_bounds = array<i64: 1>, scalar_prefetch = 0 : i64, scratch_operands = 0 : i64, tpu.core_type = #tpu.core_type<tc>, window_params = [{transform_indices = @transform_0, window_bounds = array<i64: 8, 192>}, {pipeline_mode = #tpu.pipeline_mode<synchronous>, transform_indices = @transform_1, window_bounds = array<i64: 192, 128>}, {pipeline_mode = #tpu.pipeline_mode<synchronous>, transform_indices = @transform_2, window_bounds = array<i64: 1, 128>}, {pipeline_mode = #tpu.pipeline_mode<synchronous>, transform_indices = @transform_3, window_bounds = array<i64: 128, 128>}, {pipeline_mode = #tpu.pipeline_mode<synchronous>, transform_indices = @transform_4, window_bounds = array<i64: 1, 128>}, {pipeline_mode = #tpu.pipeline_mode<synchronous>, transform_indices = @transform_5, window_bounds = array<i64: 128, 128>}, {pipeline_mode = #tpu.pipeline_mode<synchronous>, transform_indices = @transform_6, window_bounds = array<i64: 1, 128>}, {pipeline_mode = #tpu.pipeline_mode<synchronous>, transform_indices = @transform_7, window_bounds = array<i64: 128, 128>}, {pipeline_mode = #tpu.pipeline_mode<synchronous>, transform_indices = @transform_8, window_bounds = array<i64: 1, 128>}, {pipeline_mode = #tpu.pipeline_mode<synchronous>, transform_indices = @transform_9, window_bounds = array<i64: 128, 128>}, {pipeline_mode = #tpu.pipeline_mode<synchronous>, transform_indices = @transform_10, window_bounds = array<i64: 1, 128>}, {pipeline_mode = #tpu.pipeline_mode<synchronous>, transform_indices = @transform_11, window_bounds = array<i64: 128, 128>}, {pipeline_mode = #tpu.pipeline_mode<synchronous>, transform_indices = @transform_12, window_bounds = array<i64: 1, 128>}, {transform_indices = @transform_13, window_bounds = array<i64: 8, 128>}]} {
    %c0 = arith.constant 0 : index
    %c0_0 = arith.constant 0 : index
    %0 = vector.load %arg1[%c0, %c0_0] : memref<8x192xf32, #tpu.memory_space<vmem>>, vector<8x192xf32>
    %c0_1 = arith.constant 0 : index
    %c0_2 = arith.constant 0 : index
    %1 = vector.load %arg2[%c0_1, %c0_2] : memref<192x128xf32, #tpu.memory_space<vmem>>, vector<192x128xf32>
    %cst = arith.constant dense<0.000000e+00> : vector<8x128xf32>
    %2 = tpu.matmul %0, %1, %cst {dimension_numbers = #tpu.dot_dimension_numbers<[1], [0], [0], [1], [0, 0, 1, 1], [], []>} : vector<8x192xf32>, vector<192x128xf32>, vector<8x128xf32> -> vector<8x128xf32>
    %c0_3 = arith.constant 0 : index
    %c0_4 = arith.constant 0 : index
    %3 = vector.load %arg3[%c0_3, %c0_4] : memref<1x128xf32, #tpu.memory_space<vmem>>, vector<1x128xf32>
    %4 = vector.broadcast %3 : vector<1x128xf32> to vector<8x128xf32>
    %5 = arith.addf %2, %4 : vector<8x128xf32>
    %cst_5 = arith.constant 0.000000e+00 : f32
    %6 = vector.broadcast %cst_5 : f32 to vector<8x128xf32>
    %7 = arith.maximumf %5, %6 : vector<8x128xf32>
    %c0_6 = arith.constant 0 : index
    %c0_7 = arith.constant 0 : index
    %8 = vector.load %arg4[%c0_6, %c0_7] : memref<128x128xf32, #tpu.memory_space<vmem>>, vector<128x128xf32>
    %cst_8 = arith.constant dense<0.000000e+00> : vector<8x128xf32>
    %9 = tpu.matmul %7, %8, %cst_8 {dimension_numbers = #tpu.dot_dimension_numbers<[1], [0], [0], [1], [0, 0, 1, 1], [], []>} : vector<8x128xf32>, vector<128x128xf32>, vector<8x128xf32> -> vector<8x128xf32>
    %c0_9 = arith.constant 0 : index
    %c0_10 = arith.constant 0 : index
    %10 = vector.load %arg5[%c0_9, %c0_10] : memref<1x128xf32, #tpu.memory_space<vmem>>, vector<1x128xf32>
    %11 = vector.broadcast %10 : vector<1x128xf32> to vector<8x128xf32>
    %12 = arith.addf %9, %11 : vector<8x128xf32>
    %cst_11 = arith.constant 0.000000e+00 : f32
    %13 = vector.broadcast %cst_11 : f32 to vector<8x128xf32>
    %14 = arith.maximumf %12, %13 : vector<8x128xf32>
    %c0_12 = arith.constant 0 : index
    %c0_13 = arith.constant 0 : index
    %15 = vector.load %arg6[%c0_12, %c0_13] : memref<128x128xf32, #tpu.memory_space<vmem>>, vector<128x128xf32>
    %cst_14 = arith.constant dense<0.000000e+00> : vector<8x128xf32>
    %16 = tpu.matmul %14, %15, %cst_14 {dimension_numbers = #tpu.dot_dimension_numbers<[1], [0], [0], [1], [0, 0, 1, 1], [], []>} : vector<8x128xf32>, vector<128x128xf32>, vector<8x128xf32> -> vector<8x128xf32>
    %c0_15 = arith.constant 0 : index
    %c0_16 = arith.constant 0 : index
    %17 = vector.load %arg7[%c0_15, %c0_16] : memref<1x128xf32, #tpu.memory_space<vmem>>, vector<1x128xf32>
    %18 = vector.broadcast %17 : vector<1x128xf32> to vector<8x128xf32>
    %19 = arith.addf %16, %18 : vector<8x128xf32>
    %20 = arith.addf %5, %19 : vector<8x128xf32>
    %cst_17 = arith.constant 0.000000e+00 : f32
    %21 = vector.broadcast %cst_17 : f32 to vector<8x128xf32>
    %22 = arith.maximumf %20, %21 : vector<8x128xf32>
    %c0_18 = arith.constant 0 : index
    %c0_19 = arith.constant 0 : index
    %23 = vector.load %arg8[%c0_18, %c0_19] : memref<128x128xf32, #tpu.memory_space<vmem>>, vector<128x128xf32>
    %cst_20 = arith.constant dense<0.000000e+00> : vector<8x128xf32>
    %24 = tpu.matmul %22, %23, %cst_20 {dimension_numbers = #tpu.dot_dimension_numbers<[1], [0], [0], [1], [0, 0, 1, 1], [], []>} : vector<8x128xf32>, vector<128x128xf32>, vector<8x128xf32> -> vector<8x128xf32>
    %c0_21 = arith.constant 0 : index
    %c0_22 = arith.constant 0 : index
    %25 = vector.load %arg9[%c0_21, %c0_22] : memref<1x128xf32, #tpu.memory_space<vmem>>, vector<1x128xf32>
    %26 = vector.broadcast %25 : vector<1x128xf32> to vector<8x128xf32>
    %27 = arith.addf %24, %26 : vector<8x128xf32>
    %cst_23 = arith.constant 0.000000e+00 : f32
    %28 = vector.broadcast %cst_23 : f32 to vector<8x128xf32>
    %29 = arith.maximumf %27, %28 : vector<8x128xf32>
    %c0_24 = arith.constant 0 : index
    %c0_25 = arith.constant 0 : index
    %30 = vector.load %arg10[%c0_24, %c0_25] : memref<128x128xf32, #tpu.memory_space<vmem>>, vector<128x128xf32>
    %cst_26 = arith.constant dense<0.000000e+00> : vector<8x128xf32>
    %31 = tpu.matmul %29, %30, %cst_26 {dimension_numbers = #tpu.dot_dimension_numbers<[1], [0], [0], [1], [0, 0, 1, 1], [], []>} : vector<8x128xf32>, vector<128x128xf32>, vector<8x128xf32> -> vector<8x128xf32>
    %c0_27 = arith.constant 0 : index
    %c0_28 = arith.constant 0 : index
    %32 = vector.load %arg11[%c0_27, %c0_28] : memref<1x128xf32, #tpu.memory_space<vmem>>, vector<1x128xf32>
    %33 = vector.broadcast %32 : vector<1x128xf32> to vector<8x128xf32>
    %34 = arith.addf %31, %33 : vector<8x128xf32>
    %35 = arith.addf %20, %34 : vector<8x128xf32>
    %cst_29 = arith.constant 0.000000e+00 : f32
    %36 = vector.broadcast %cst_29 : f32 to vector<8x128xf32>
    %37 = arith.maximumf %35, %36 : vector<8x128xf32>
    %c0_30 = arith.constant 0 : index
    %c0_31 = arith.constant 0 : index
    %38 = vector.load %arg12[%c0_30, %c0_31] : memref<128x128xf32, #tpu.memory_space<vmem>>, vector<128x128xf32>
    %cst_32 = arith.constant dense<0.000000e+00> : vector<8x128xf32>
    %39 = tpu.matmul %37, %38, %cst_32 {dimension_numbers = #tpu.dot_dimension_numbers<[1], [0], [0], [1], [0, 0, 1, 1], [], []>} : vector<8x128xf32>, vector<128x128xf32>, vector<8x128xf32> -> vector<8x128xf32>
    %c0_33 = arith.constant 0 : index
    %c0_34 = arith.constant 0 : index
    %40 = vector.load %arg13[%c0_33, %c0_34] : memref<1x128xf32, #tpu.memory_space<vmem>>, vector<1x128xf32>
    %41 = vector.broadcast %40 : vector<1x128xf32> to vector<8x128xf32>
    %42 = arith.addf %39, %41 : vector<8x128xf32>
    %cst_35 = arith.constant 0.000000e+00 : f32
    %43 = vector.broadcast %cst_35 : f32 to vector<8x128xf32>
    %44 = arith.maximumf %42, %43 : vector<8x128xf32>
    %c0_36 = arith.constant 0 : index
    %c0_37 = arith.constant 0 : index
    %45 = vector.load %arg14[%c0_36, %c0_37] : memref<8x128xf32, #tpu.memory_space<vmem>>, vector<8x128xf32>
    tpu.vector_store %arg14[%c0_36, %c0_37], %44 {strides = array<i32>} : memref<8x128xf32, #tpu.memory_space<vmem>>, vector<8x128xf32>,
    return
  }
  func.func @transform_0(%arg0: i32) -> (i32, i32) {
    %c0_i32 = arith.constant 0 : i32
    %c0_i32_0 = arith.constant 0 : i32
    return %arg0, %c0_i32 : i32, i32
  }
  func.func @transform_1(%arg0: i32) -> (i32, i32) {
    %c0_i32 = arith.constant 0 : i32
    %c0_i32_0 = arith.constant 0 : i32
    %c0_i32_1 = arith.constant 0 : i32
    return %c0_i32, %c0_i32_0 : i32, i32
  }
  func.func @transform_2(%arg0: i32) -> (i32, i32) {
    %c0_i32 = arith.constant 0 : i32
    %c0_i32_0 = arith.constant 0 : i32
    %c0_i32_1 = arith.constant 0 : i32
    return %c0_i32, %c0_i32_0 : i32, i32
  }
  func.func @transform_3(%arg0: i32) -> (i32, i32) {
    %c0_i32 = arith.constant 0 : i32
    %c0_i32_0 = arith.constant 0 : i32
    %c0_i32_1 = arith.constant 0 : i32
    return %c0_i32, %c0_i32_0 : i32, i32
  }
  func.func @transform_4(%arg0: i32) -> (i32, i32) {
    %c0_i32 = arith.constant 0 : i32
    %c0_i32_0 = arith.constant 0 : i32
    %c0_i32_1 = arith.constant 0 : i32
    return %c0_i32, %c0_i32_0 : i32, i32
  }
  func.func @transform_5(%arg0: i32) -> (i32, i32) {
    %c0_i32 = arith.constant 0 : i32
    %c0_i32_0 = arith.constant 0 : i32
    %c0_i32_1 = arith.constant 0 : i32
    return %c0_i32, %c0_i32_0 : i32, i32
  }
  func.func @transform_6(%arg0: i32) -> (i32, i32) {
    %c0_i32 = arith.constant 0 : i32
    %c0_i32_0 = arith.constant 0 : i32
    %c0_i32_1 = arith.constant 0 : i32
    return %c0_i32, %c0_i32_0 : i32, i32
  }
  func.func @transform_7(%arg0: i32) -> (i32, i32) {
    %c0_i32 = arith.constant 0 : i32
    %c0_i32_0 = arith.constant 0 : i32
    %c0_i32_1 = arith.constant 0 : i32
    return %c0_i32, %c0_i32_0 : i32, i32
  }
  func.func @transform_8(%arg0: i32) -> (i32, i32) {
    %c0_i32 = arith.constant 0 : i32
    %c0_i32_0 = arith.constant 0 : i32
    %c0_i32_1 = arith.constant 0 : i32
    return %c0_i32, %c0_i32_0 : i32, i32
  }
  func.func @transform_9(%arg0: i32) -> (i32, i32) {
    %c0_i32 = arith.constant 0 : i32
    %c0_i32_0 = arith.constant 0 : i32
    %c0_i32_1 = arith.constant 0 : i32
    return %c0_i32, %c0_i32_0 : i32, i32
  }
  func.func @transform_10(%arg0: i32) -> (i32, i32) {
    %c0_i32 = arith.constant 0 : i32
    %c0_i32_0 = arith.constant 0 : i32
    %c0_i32_1 = arith.constant 0 : i32
    return %c0_i32, %c0_i32_0 : i32, i32
  }
  func.func @transform_11(%arg0: i32) -> (i32, i32) {
    %c0_i32 = arith.constant 0 : i32
    %c0_i32_0 = arith.constant 0 : i32
    %c0_i32_1 = arith.constant 0 : i32
    return %c0_i32, %c0_i32_0 : i32, i32
  }
  func.func @transform_12(%arg0: i32) -> (i32, i32) {
    %c0_i32 = arith.constant 0 : i32
    %c0_i32_0 = arith.constant 0 : i32
    %c0_i32_1 = arith.constant 0 : i32
    return %c0_i32, %c0_i32_0 : i32, i32
  }
  func.func @transform_13(%arg0: i32) -> (i32, i32) {
    %c0_i32 = arith.constant 0 : i32
    %c0_i32_0 = arith.constant 0 : i32
    return %arg0, %c0_i32 : i32, i32
  }
}

</mosaic_0001>

<bundles_post_ra>
// kernel: patch_encoder2_forward.1
= control target key start
LH: loop header
LB: loop body
LE: loop exit
PB: predicated region body
PF: predicated region fallthrough
CT: control target
= control target key end

     0   :  { %v932_v1 = vmov 0.0   ;;  %vm78_vm0 = vcmask 523264   ;;  %s1466_s0 = inlined_call_operand.vmem [shape: f32[8,192], index: 0, kind: input, shape index: {}]   ;;  %s1467_s1 = inlined_call_operand.vmem [shape: f32[192,128], index: 1, kind: input, shape index: {}]   ;;  %s1468_s2 = inlined_call_operand.vmem [shape: f32[1,128], index: 2, kind: input, shape index: {}]   ;;  %s1469_s3 = inlined_call_operand.vmem [shape: f32[128,128], index: 3, kind: input, shape index: {}]   ;;  %s1470_s4 = inlined_call_operand.vmem [shape: f32[1,128], index: 4, kind: input, shape index: {}]   ;;  %s1471_s5 = inlined_call_operand.vmem [shape: f32[128,128], index: 5, kind: input, shape index: {}]   ;;  %s1472_s6 = inlined_call_operand.vmem [shape: f32[1,128], index: 6, kind: input, shape index: {}]   ;;  %s1473_s7 = inlined_call_operand.vmem [shape: f32[128,128], index: 7, kind: input, shape index: {}]   ;;  %s1474_s8 = inlined_call_operand.vmem [shape: f32[1,128], index: 8, kind: input, shape index: {}]   ;;  %s1475_s9 = inlined_call_operand.vmem [shape: f32[128,128], index: 9, kind: input, shape index: {}]   ;;  %s1476_s10 = inlined_call_operand.vmem [shape: f32[1,128], index: 10, kind: input, shape index: {}]   ;;  %s1477_s11 = inlined_call_operand.vmem [shape: f32[128,128], index: 11, kind: input, shape index: {}]   ;;  %s1478_s12 = inlined_call_operand.vmem [shape: f32[1,128], index: 12, kind: input, shape index: {}]   ;;  %s1479_s13 = inlined_call_operand.hbm [shape: f32[8,128], index: 13, kind: output, shape index: {}]  }
   0x1   :  { %v62_v0 = vld [vmem:[%s1467_s1 + $0x78] sm:$0xff]  ;;  %82 = vmatprep.subr.mxu0 %v932_v1  ;;  %v61_v2 = vld [vmem:[%s1467_s1 + $0x70] sm:$0xff]  ;;  %732 = vmatprep.subr.mxu1 %v932_v1  ;;  %v60_v3 = vld [vmem:[%s1467_s1 + $0x68] sm:$0xff] }
   0x2   :  { %83 = vmatpush1.msra.mxu0 %v62_v0  ;;  %v59_v4 = vld [vmem:[%s1467_s1 + $0x60] sm:$0xff]  ;;  %v58_v5 = vld [vmem:[%s1467_s1 + $0x58] sm:$0xff]  ;;  %v46_v6 = vld [vmem:[%s1466_s0 + $0x8] sm:$0xff] }
   0x3   :  { %84 = vmatprep.subr.mxu0 %v932_v1  ;;  %v168_v7 = vld [vmem:[%s1469_s3 + $0x78] sm:$0xff]  ;;  %v57_v8 = vld [vmem:[%s1467_s1 + $0x50] sm:$0xff]  ;;  %641 = vmatprep.mubr.msk.f32.mxu0 %vm78_vm0, %v46_v6  ;;  %v56_v10 = vld [vmem:[%s1467_s1 + $0x48] sm:$0xff] }
   0x4   :  { %85 = vmatpush1.msra.mxu0 %v61_v2  ;;  %v167_v9 = vld [vmem:[%s1469_s3 + $0x70] sm:$0xff]  ;;  %733 = vmatpush3.msra.mxu1 %v168_v7  ;;  %v166_v11 = vld [vmem:[%s1469_s3 + $0x68] sm:$0xff]  ;;  %v55_v12 = vld [vmem:[%s1467_s1 + $0x40] sm:$0xff] }
   0x5   :  { %86 = vmatprep.subr.mxu0 %v932_v1  ;;  %734 = vmatprep.subr.mxu1 %v932_v1  ;;  %v165_v13 = vld [vmem:[%s1469_s3 + $0x60] sm:$0xff] }
   0x6   :  { %87 = vmatpush1.msra.mxu0 %v60_v3  ;;  %735 = vmatpush3.msra.mxu1 %v167_v9 }
   0x7   :  { %88 = vmatprep.subr.mxu0 %v932_v1  ;;  %736 = vmatprep.subr.mxu1 %v932_v1 }
   0x8   :  { %89 = vmatpush1.msra.mxu0 %v59_v4 }
   0x9   :  { %90 = vmatprep.subr.mxu0 %v932_v1 }
   0xa   :  { %91 = vmatpush1.msra.mxu0 %v58_v5 }
   0xb   :  { %92 = vmatprep.subr.mxu0 %v932_v1 }
   0xc   :  { %93 = vmatpush1.msra.mxu0 %v57_v8 }
   0xd   :  { %94 = vmatprep.subr.mxu0 %v932_v1 }
   0xe   :  { %18 = vsyncpa [#allocation3], 0  ;;  %95 = vmatpush1.msra.mxu0 %v56_v10  ;;  %737 = vmatpush3.msra.mxu1 %v166_v11  ;;  %v54_v14 = vld [vmem:[%s1467_s1 + $0x38] sm:$0xff]  ;;  %v53_v16 = vld [vmem:[%s1467_s1 + $0x30] sm:$0xff]  ;;  %vm933_vm1 = vmmov 0  }
   0xf   :  { %96 = vmatprep.subr.mxu0 %v932_v1  ;;  %738 = vmatprep.subr.mxu1 %v932_v1  ;;  %v164_v15 = vld [vmem:[%s1469_s3 + $0x58] sm:$0xff]  ;;  %v163_v17 = vld [vmem:[%s1469_s3 + $0x50] sm:$0xff]  ;;  %v52_v18 = vld [vmem:[%s1467_s1 + $0x28] sm:$0xff] }
  0x10   :  { %97 = vmatpush1.msra.mxu0 %v55_v12  ;;  %739 = vmatpush3.msra.mxu1 %v165_v13  ;;  %v162_v19 = vld [vmem:[%s1469_s3 + $0x48] sm:$0xff]  ;;  %v51_v20 = vld [vmem:[%s1467_s1 + $0x20] sm:$0xff]  ;;  %v50_v22 = vld [vmem:[%s1467_s1 + $0x18] sm:$0xff] }
  0x11   :  { %98 = vmatprep.subr.mxu0 %v932_v1  ;;  %740 = vmatprep.subr.mxu1 %v932_v1  ;;  %v161_v21 = vld [vmem:[%s1469_s3 + $0x40] sm:$0xff]  ;;  %v160_v23 = vld [vmem:[%s1469_s3 + $0x38] sm:$0xff]  ;;  %v49_v24 = vld [vmem:[%s1467_s1 + $0x10] sm:$0xff] }
  0x12   :  { %99 = vmatpush1.msra.mxu0 %v54_v14  ;;  %741 = vmatpush3.msra.mxu1 %v164_v15  ;;  %v159_v25 = vld [vmem:[%s1469_s3 + $0x30] sm:$0xff]  ;;  %v48_v26 = vld [vmem:[%s1467_s1 + $0x8] sm:$0xff]  ;;  %v47_v28 = vld [vmem:[%s1467_s1] sm:$0xff] }
  0x13   :  { %100 = vmatprep.subr.mxu0 %v932_v1  ;;  %742 = vmatprep.subr.mxu1 %v932_v1  ;;  %v158_v27 = vld [vmem:[%s1469_s3 + $0x28] sm:$0xff]  ;;  %v157_v29 = vld [vmem:[%s1469_s3 + $0x20] sm:$0xff]  ;;  %v70_v30 = vld [vmem:[%s1467_s1 + $0xb8] sm:$0xff] }
  0x14   :  { %101 = vmatpush1.msra.mxu0 %v53_v16  ;;  %743 = vmatpush3.msra.mxu1 %v163_v17  ;;  %v156_v31 = vld [vmem:[%s1469_s3 + $0x18] sm:$0xff]  ;;  %v69_v32 = vld [vmem:[%s1467_s1 + $0xb0] sm:$0xff]  ;;  %v68_v33 = vld [vmem:[%s1467_s1 + $0xa8] sm:$0xff] }
  0x15   :  { %102 = vmatprep.subr.mxu0 %v932_v1  ;;  %744 = vmatprep.subr.mxu1 %v932_v1  ;;  %v67_v34 = vld [vmem:[%s1467_s1 + $0xa0] sm:$0xff]  ;;  %v66_v35 = vld [vmem:[%s1467_s1 + $0x98] sm:$0xff]  ;;  %v65_v36 = vld [vmem:[%s1467_s1 + $0x90] sm:$0xff] }
  0x16   :  { %103 = vmatpush1.msra.mxu0 %v52_v18  ;;  %745 = vmatpush3.msra.mxu1 %v162_v19  ;;  %v64_v37 = vld [vmem:[%s1467_s1 + $0x88] sm:$0xff]  ;;  %v63_v38 = vld [vmem:[%s1467_s1 + $0x80] sm:$0xff]  ;;  %v155_v40 = vld [vmem:[%s1469_s3 + $0x10] sm:$0xff] }
  0x17   :  { %104 = vmatprep.subr.mxu0 %v932_v1  ;;  %746 = vmatprep.subr.mxu1 %v932_v1  ;;  %v45_v39 = vld [vmem:[%s1466_s0] sm:$0xff]  ;;  %v154_v41 = vld [vmem:[%s1469_s3 + $0x8] sm:$0xff]  ;;  %v262_v48 = vld [vmem:[%s1471_s5 + $0x78] sm:$0xff]  ;;  %s934_s0 = smov [#allocation2]  }
  0x18   :  { %105 = vmatpush1.msra.mxu0 %v51_v20  ;;  %747 = vmatpush3.msra.mxu1 %v161_v21  ;;  %v153_v42 = vld [vmem:[%s1469_s3] sm:$0xff]  ;;  %v261_v49 = vld [vmem:[%s1471_s5 + $0x70] sm:$0xff]  ;;  %v260_v50 = vld [vmem:[%s1471_s5 + $0x68] sm:$0xff] }
  0x19   :  { %106 = vmatprep.subr.mxu0 %v932_v1  ;;  %748 = vmatprep.subr.mxu1 %v932_v1  ;;  %v640_v43 = vld [vmem:[%s1468_s2] ss:$0 sm:$0xff]  ;;  %v258_v52 = vld [vmem:[%s1471_s5 + $0x58] sm:$0xff]  ;;  %v257_v53 = vld [vmem:[%s1471_s5 + $0x50] sm:$0xff] }
  0x1a   :  { %107 = vmatpush1.msra.mxu0 %v50_v22  ;;  %749 = vmatpush3.msra.mxu1 %v160_v23  ;;  %v259_v51 = vld [vmem:[%s1471_s5 + $0x60] sm:$0xff]  ;;  %v256_v54 = vld [vmem:[%s1471_s5 + $0x48] sm:$0xff]  ;;  %v254_v56 = vld [vmem:[%s1471_s5 + $0x38] sm:$0xff] }
  0x1b   :  { %108 = vmatprep.subr.mxu0 %v932_v1  ;;  %750 = vmatprep.subr.mxu1 %v932_v1  ;;  %v255_v55 = vld [vmem:[%s1471_s5 + $0x40] sm:$0xff]  ;;  %v253_v57 = vld [vmem:[%s1471_s5 + $0x30] sm:$0xff]  ;;  %v252_v58 = vld [vmem:[%s1471_s5 + $0x28] sm:$0xff] }
  0x1c   :  { %109 = vmatpush1.msra.mxu0 %v49_v24  ;;  %751 = vmatpush3.msra.mxu1 %v159_v25  ;;  %v251_v59 = vld [vmem:[%s1471_s5 + $0x20] sm:$0xff]  ;;  %v250_v60 = vld [vmem:[%s1471_s5 + $0x18] sm:$0xff]  ;;  %v249_v61 = vld [vmem:[%s1471_s5 + $0x10] sm:$0xff] }
  0x1d   :  { %110 = vmatprep.subr.mxu0 %v932_v1  ;;  %752 = vmatprep.subr.mxu1 %v932_v1  ;;  %v248_v62 = vld [vmem:[%s1471_s5 + $0x8] sm:$0xff]  ;;  %v247_v63 = vld [vmem:[%s1471_s5] sm:$0xff]  ;;  %v357_v0 = vld [vmem:[%s1473_s7 + $0x78] sm:$0xff] }
  0x1e   :  { %111 = vmatpush1.msra.mxu0 %v48_v26  ;;  %753 = vmatpush3.msra.mxu1 %v158_v27  ;;  %v356_v2 = vld [vmem:[%s1473_s7 + $0x70] sm:$0xff]  ;;  %v355_v3 = vld [vmem:[%s1473_s7 + $0x68] sm:$0xff]  ;;  %v354_v4 = vld [vmem:[%s1473_s7 + $0x60] sm:$0xff] }
  0x1f   :  { %112 = vmatprep.subr.mxu0 %v932_v1  ;;  %754 = vmatprep.subr.mxu1 %v932_v1  ;;  %v353_v5 = vld [vmem:[%s1473_s7 + $0x58] sm:$0xff]  ;;  %v352_v6 = vld [vmem:[%s1473_s7 + $0x50] sm:$0xff]  ;;  %v351_v7 = vld [vmem:[%s1473_s7 + $0x48] sm:$0xff] }
  0x20   :  { %113 = vmatpush1.msra.mxu0 %v47_v28  ;;  %755 = vmatpush3.msra.mxu1 %v157_v29  ;;  %v350_v8 = vld [vmem:[%s1473_s7 + $0x40] sm:$0xff]  ;;  %v349_v9 = vld [vmem:[%s1473_s7 + $0x38] sm:$0xff]  ;;  %v348_v10 = vld [vmem:[%s1473_s7 + $0x30] sm:$0xff] }
  0x21   :  { %130 = vmatprep.subr.mxu0 %v932_v1  ;;  %756 = vmatprep.subr.mxu1 %v932_v1  ;;  %v347_v11 = vld [vmem:[%s1473_s7 + $0x28] sm:$0xff]  ;;  %v346_v12 = vld [vmem:[%s1473_s7 + $0x20] sm:$0xff]  ;;  %v345_v18 = vld [vmem:[%s1473_s7 + $0x18] sm:$0xff] }
  0x22   :  { %131 = vmatpush2.msra.mxu0 %v70_v30  ;;  %757 = vmatpush3.msra.mxu1 %v156_v31  ;;  %v642_v13 = vld [vmem:[%s1470_s4] ss:$0 sm:$0xff]  ;;  %v344_v19 = vld [vmem:[%s1473_s7 + $0x10] sm:$0xff]  ;;  %v343_v20 = vld [vmem:[%s1473_s7 + $0x8] sm:$0xff]  ;;  %s632_s4 = sshll.u32 %s934_s0, 4  ;;  %s633_s4 = int_to_ptr.vmem [resolvable:$true] %s632_s4 }
  0x23   :  { %132 = vmatprep.subr.mxu0 %v932_v1  ;;  %758 = vmatprep.subr.mxu1 %v932_v1  ;;  %v342_v21 = vld [vmem:[%s1473_s7] sm:$0xff]  ;;  %v451_v22 = vld [vmem:[%s1475_s9 + $0x78] sm:$0xff]  ;;  %v450_v23 = vld [vmem:[%s1475_s9 + $0x70] sm:$0xff]  ;;  %p915_p1 = scmp.lt.s32.totalorder %s633_s4, %s633_s4 }
  0x24   :  { %133 = vmatpush2.msra.mxu0 %v69_v32  ;;  %759 = vmatpush3.msra.mxu1 %v155_v40  ;;  %v449_v24 = vld [vmem:[%s1475_s9 + $0x68] sm:$0xff]  ;;  %v448_v25 = vld [vmem:[%s1475_s9 + $0x60] sm:$0xff]  ;;  %v447_v26 = vld [vmem:[%s1475_s9 + $0x58] sm:$0xff] }
  0x25   :  { %134 = vmatprep.subr.mxu0 %v932_v1  ;;  %760 = vmatprep.subr.mxu1 %v932_v1  ;;  %v446_v27 = vld [vmem:[%s1475_s9 + $0x50] sm:$0xff]  ;;  %v445_v28 = vld [vmem:[%s1475_s9 + $0x48] sm:$0xff]  ;;  %v444_v29 = vld [vmem:[%s1475_s9 + $0x40] sm:$0xff] }
  0x26   :  { %135 = vmatpush2.msra.mxu0 %v68_v33  ;;  %761 = vmatpush3.msra.mxu1 %v154_v41  ;;  %v443_v30 = vld [vmem:[%s1475_s9 + $0x38] sm:$0xff]  ;;  %v442_v31 = vld [vmem:[%s1475_s9 + $0x30] sm:$0xff]  ;;  %v441_v32 = vld [vmem:[%s1475_s9 + $0x28] sm:$0xff] }
  0x27   :  { %136 = vmatprep.subr.mxu0 %v932_v1  ;;  %762 = vmatprep.subr.mxu1 %v932_v1  ;;  %v440_v33 = vld [vmem:[%s1475_s9 + $0x20] sm:$0xff]  ;;  %v438_v41 = vld [vmem:[%s1475_s9 + $0x10] sm:$0xff] }
  0x28   :  { %137 = vmatpush2.msra.mxu0 %v67_v34  ;;  %763 = vmatpush3.msra.mxu1 %v153_v42  ;;  %v439_v34 = vld [vmem:[%s1475_s9 + $0x18] sm:$0xff]  ;;  %v437_v42 = vld [vmem:[%s1475_s9 + $0x8] sm:$0xff] }
  0x29   :  { %138 = vmatprep.subr.mxu0 %v932_v1  ;;  %764 = vmatprep.mubr.msk.f32.mxu1 %vm933_vm1, %v932_v1 }
  0x2a   :  { %139 = vmatpush2.msra.mxu0 %v66_v35  ;;  %767 = vmatprep.subr.mxu1 %v932_v1  ;;  %v643_v35 = vld [vmem:[%s1472_s6] ss:$0 sm:$0xff] }
  0x2b   :  { %140 = vmatprep.subr.mxu0 %v932_v1 }
  0x2c   :  { %141 = vmatpush2.msra.mxu0 %v65_v36 }
  0x2d   :  { %142 = vmatprep.subr.mxu0 %v932_v1 }
  0x2e   :  { %143 = vmatpush2.msra.mxu0 %v64_v37 }
  0x2f   :  { %144 = vmatprep.subr.mxu0 %v932_v1 }
  0x30   :  { %145 = vmatpush2.msra.mxu0 %v63_v38 }
  0x31   :  { %147 = vmatmul.mubr.f32.vlgmr.msra.gmra.mxu0 %v45_v39  ;;  %802 = vmatprep.subr.mxu0 %v932_v1 }
  0x32   :  { %834 = vmatprep.mubr.msk.f32.mxu0 %vm933_vm1, %v932_v1  ;;  %803 = vmatpush3.msra.mxu0 %v357_v0  ;;  %v531_v0 = vld [vmem:[%s1477_s11] sm:$0xff] }
  0x33   :  { %804 = vmatprep.subr.mxu0 %v932_v1 }
  0x34   :  { %805 = vmatpush3.msra.mxu0 %v356_v2  ;;  %v645_v2 = vld [vmem:[%s1476_s10] ss:$0 sm:$0xff]  ;;  %s910_s10 = scalar_lea.vmem %s633_s4, 128 }
  0x35   :  { %806 = vmatprep.subr.mxu0 %v932_v1  ;;  %p911_p0 = scmp.ne.s32.totalorder %s633_s4, %s910_s10  ;;  %p916_p2 = scmp.lt.s32.totalorder %s910_s10, %s910_s10 }
  0x36   :  { %807 = vmatpush3.msra.mxu0 %v355_v3 }
  0x37   :  { %808 = vmatprep.subr.mxu0 %v932_v1  ;;  %p917_p3 = por %p916_p2, %p915_p1 }
  0x38   :  { %809 = vmatpush3.msra.mxu0 %v354_v4 }
  0x39   :  { %810 = vmatprep.subr.mxu0 %v932_v1  ;;  %p918_p4 = pnand %p917_p3, %p911_p0 }
  0x3a   :  { %811 = vmatpush3.msra.mxu0 %v353_v5 }
  0x3b   :  { %812 = vmatprep.subr.mxu0 %v932_v1 }
  0x3c   :  { %813 = vmatpush3.msra.mxu0 %v352_v6 }
  0x3d   :  { %814 = vmatprep.subr.mxu0 %v932_v1 }
  0x3e   :  { %815 = vmatpush3.msra.mxu0 %v351_v7 }
  0x3f   :  { %816 = vmatprep.subr.mxu0 %v932_v1 }
  0x40   :  { %817 = vmatpush3.msra.mxu0 %v350_v8 }
  0x41   :  { %818 = vmatprep.subr.mxu0 %v932_v1 }
  0x42   :  { %819 = vmatpush3.msra.mxu0 %v349_v9 }
  0x43   :  { %820 = vmatprep.subr.mxu0 %v932_v1 }
  0x44   :  { %821 = vmatpush3.msra.mxu0 %v348_v10 }
  0x45   :  { %822 = vmatprep.subr.mxu0 %v932_v1 }
  0x46   :  { %823 = vmatpush3.msra.mxu0 %v347_v11 }
  0x47   :  { %824 = vmatprep.subr.mxu0 %v932_v1 }
  0x48   :  { %825 = vmatpush3.msra.mxu0 %v346_v12 }
  0x49   :  { %826 = vmatprep.subr.mxu0 %v932_v1 }
  0x4a   :  { %827 = vmatpush3.msra.mxu0 %v345_v18 }
  0x4b   :  { %828 = vmatprep.subr.mxu0 %v932_v1 }
  0x4c   :  { %829 = vmatpush3.msra.mxu0 %v344_v19 }
  0x4d   :  { %830 = vmatprep.subr.mxu0 %v932_v1 }
  0x4e   :  { %831 = vmatpush3.msra.mxu0 %v343_v20 }
  0x4f   :  { %832 = vmatprep.subr.mxu0 %v932_v1 }
  0x50   :  { %833 = vmatpush3.msra.mxu0 %v342_v21 }
  0x51   :  { %872 = vmatprep.subr.mxu0 %v932_v1 }
  0xf1   :  { %v148_v44 = vpop.f32.mrf.mxu0 }
  0xf2   :  { %v1180_v45 = vadd.f32 %v640_v43, %v148_v44  ;;  %v436_v43 = vld [vmem:[%s1475_s9] sm:$0xff]  ;;  %v546_v44 = vld [vmem:[%s1477_s11 + $0x78] sm:$0xff] }
  0xf3   :  { %v150_v46 = vpop.f32.mrf.mxu0 }
  0xf4   :  { %v152_v47 = vmax.f32 %v1180_v45, 0.0  ;;  %v544_v46 = vld [vmem:[%s1477_s11 + $0x68] sm:$0xff] }
  0xf6   :  { %765 = vmatmul.mubr.f32.vlgmr.msra.gmra.mxu1 %v152_v47  ;;  %v543_v47 = vld [vmem:[%s1477_s11 + $0x60] sm:$0xff] }
  0xf7   :  { %768 = vmatpush3.msra.mxu1 %v262_v48  ;;  %799 = vmatprep.mubr.msk.f32.mxu1 %vm933_vm1, %v932_v1  ;;  %v542_v48 = vld [vmem:[%s1477_s11 + $0x58] sm:$0xff] }
  0xf8   :  { %769 = vmatprep.subr.mxu1 %v932_v1 }
  0xf9   :  { %770 = vmatpush3.msra.mxu1 %v261_v49  ;;  %v541_v49 = vld [vmem:[%s1477_s11 + $0x50] sm:$0xff] }
  0xfa   :  { %771 = vmatprep.subr.mxu1 %v932_v1 }
  0xfb   :  { %772 = vmatpush3.msra.mxu1 %v260_v50  ;;  %v540_v50 = vld [vmem:[%s1477_s11 + $0x48] sm:$0xff] }
  0xfc   :  { %773 = vmatprep.subr.mxu1 %v932_v1 }
  0xfd   :  { %774 = vmatpush3.msra.mxu1 %v259_v51  ;;  %v539_v51 = vld [vmem:[%s1477_s11 + $0x40] sm:$0xff] }
  0xfe   :  { %775 = vmatprep.subr.mxu1 %v932_v1 }
  0xff   :  { %776 = vmatpush3.msra.mxu1 %v258_v52  ;;  %v538_v52 = vld [vmem:[%s1477_s11 + $0x38] sm:$0xff] }
 0x100   :  { %777 = vmatprep.subr.mxu1 %v932_v1 }
 0x101   :  { %778 = vmatpush3.msra.mxu1 %v257_v53  ;;  %v537_v53 = vld [vmem:[%s1477_s11 + $0x30] sm:$0xff] }
 0x102   :  { %779 = vmatprep.subr.mxu1 %v932_v1 }
 0x103   :  { %780 = vmatpush3.msra.mxu1 %v256_v54  ;;  %v536_v54 = vld [vmem:[%s1477_s11 + $0x28] sm:$0xff] }
 0x104   :  { %781 = vmatprep.subr.mxu1 %v932_v1 }
 0x105   :  { %782 = vmatpush3.msra.mxu1 %v255_v55  ;;  %v535_v55 = vld [vmem:[%s1477_s11 + $0x20] sm:$0xff] }
 0x106   :  { %783 = vmatprep.subr.mxu1 %v932_v1 }
 0x107   :  { %784 = vmatpush3.msra.mxu1 %v254_v56  ;;  %v644_v56 = vld [vmem:[%s1474_s8] ss:$0 sm:$0xff] }
 0x108   :  { %785 = vmatprep.subr.mxu1 %v932_v1 }
 0x109   :  { %786 = vmatpush3.msra.mxu1 %v253_v57 }
 0x10a   :  { %787 = vmatprep.subr.mxu1 %v932_v1 }
 0x10b   :  { %788 = vmatpush3.msra.mxu1 %v252_v58 }
 0x10c   :  { %789 = vmatprep.subr.mxu1 %v932_v1 }
 0x10d   :  { %790 = vmatpush3.msra.mxu1 %v251_v59 }
 0x10e   :  { %791 = vmatprep.subr.mxu1 %v932_v1 }
 0x10f   :  { %792 = vmatpush3.msra.mxu1 %v250_v60 }
 0x110   :  { %793 = vmatprep.subr.mxu1 %v932_v1 }
 0x111   :  { %794 = vmatpush3.msra.mxu1 %v249_v61  ;;  %v534_v61 = vld [vmem:[%s1477_s11 + $0x18] sm:$0xff] }
 0x112   :  { %795 = vmatprep.subr.mxu1 %v932_v1 }
 0x113   :  { %796 = vmatpush3.msra.mxu1 %v248_v62  ;;  %v533_v62 = vld [vmem:[%s1477_s11 + $0x10] sm:$0xff] }
 0x114   :  { %797 = vmatprep.subr.mxu1 %v932_v1 }
 0x115   :  { %798 = vmatpush3.msra.mxu1 %v247_v63  ;;  %v532_v63 = vld [vmem:[%s1477_s11 + $0x8] sm:$0xff] }
 0x116   :  { %837 = vmatprep.subr.mxu1 %v932_v1 }
 0x1b6   :  { %v242_v14 = vpop.f32.mrf.mxu1 }
 0x1b7   :  { %v243_v15 = vadd.f32 %v642_v13, %v242_v14 }
 0x1b8   :  { %v766_v16 = vpop.f32.mrf.mxu1 }
 0x1b9   :  { %v246_v17 = vmax.f32 %v243_v15, 0.0 }
 0x1bb   :  { %800 = vmatmul.mubr.f32.vlgmr.msra.gmra.mxu1 %v246_v17 }
 0x1bc   :  { %869 = vmatprep.mubr.msk.f32.mxu1 %vm933_vm1, %v932_v1  ;;  %838 = vmatpush3.msra.mxu1 %v451_v22 }
 0x1bd   :  { %839 = vmatprep.subr.mxu1 %v932_v1 }
 0x1be   :  { %840 = vmatpush3.msra.mxu1 %v450_v23 }
 0x1bf   :  { %841 = vmatprep.subr.mxu1 %v932_v1 }
 0x1c0   :  { %842 = vmatpush3.msra.mxu1 %v449_v24 }
 0x1c1   :  { %843 = vmatprep.subr.mxu1 %v932_v1 }
 0x1c2   :  { %844 = vmatpush3.msra.mxu1 %v448_v25 }
 0x1c3   :  { %845 = vmatprep.subr.mxu1 %v932_v1 }
 0x1c4   :  { %846 = vmatpush3.msra.mxu1 %v447_v26 }
 0x1c5   :  { %847 = vmatprep.subr.mxu1 %v932_v1 }
 0x1c6   :  { %848 = vmatpush3.msra.mxu1 %v446_v27 }
 0x1c7   :  { %849 = vmatprep.subr.mxu1 %v932_v1 }
 0x1c8   :  { %850 = vmatpush3.msra.mxu1 %v445_v28 }
 0x1c9   :  { %851 = vmatprep.subr.mxu1 %v932_v1 }
 0x1ca   :  { %852 = vmatpush3.msra.mxu1 %v444_v29 }
 0x1cb   :  { %853 = vmatprep.subr.mxu1 %v932_v1 }
 0x1cc   :  { %854 = vmatpush3.msra.mxu1 %v443_v30 }
 0x1cd   :  { %855 = vmatprep.subr.mxu1 %v932_v1 }
 0x1ce   :  { %856 = vmatpush3.msra.mxu1 %v442_v31 }
 0x1cf   :  { %857 = vmatprep.subr.mxu1 %v932_v1 }
 0x1d0   :  { %858 = vmatpush3.msra.mxu1 %v441_v32 }
 0x1d1   :  { %859 = vmatprep.subr.mxu1 %v932_v1 }
 0x1d2   :  { %860 = vmatpush3.msra.mxu1 %v440_v33 }
 0x1d3   :  { %861 = vmatprep.subr.mxu1 %v932_v1 }
 0x1d4   :  { %862 = vmatpush3.msra.mxu1 %v439_v34 }
 0x1d5   :  { %863 = vmatprep.subr.mxu1 %v932_v1 }
 0x1d6   :  { %864 = vmatpush3.msra.mxu1 %v438_v41 }
 0x1d7   :  { %865 = vmatprep.subr.mxu1 %v932_v1 }
 0x1d8   :  { %866 = vmatpush3.msra.mxu1 %v437_v42 }
 0x1d9   :  { %867 = vmatprep.subr.mxu1 %v932_v1 }
 0x1da   :  { %868 = vmatpush3.msra.mxu1 %v436_v43 }
 0x27b   :  { %v336_v36 = vpop.f32.mrf.mxu1 }
 0x27c   :  { %v337_v37 = vadd.f32 %v643_v35, %v336_v36 }
 0x27d   :  { %v801_v38 = vpop.f32.mrf.mxu1 }
 0x27e   :  { %v1374_v39 = vadd.f32 %v337_v37, %v1180_v45  ;;  %v545_v45 = vld [vmem:[%s1477_s11 + $0x70] sm:$0xff] }
 0x280   :  { %v341_v40 = vmax.f32 %v1374_v39, 0.0 }
 0x282   :  { %835 = vmatmul.mubr.f32.vlgmr.msra.gmra.mxu0 %v341_v40 }
 0x283   :  { %904 = vmatprep.mubr.msk.f32.mxu0 %vm933_vm1, %v932_v1  ;;  %873 = vmatpush3.msra.mxu0 %v546_v44 }
 0x284   :  { %874 = vmatprep.subr.mxu0 %v932_v1 }
 0x285   :  { %875 = vmatpush3.msra.mxu0 %v545_v45 }
 0x286   :  { %876 = vmatprep.subr.mxu0 %v932_v1 }
 0x287   :  { %877 = vmatpush3.msra.mxu0 %v544_v46 }
 0x288   :  { %878 = vmatprep.subr.mxu0 %v932_v1 }
 0x289   :  { %879 = vmatpush3.msra.mxu0 %v543_v47 }
 0x28a   :  { %880 = vmatprep.subr.mxu0 %v932_v1 }
 0x28b   :  { %881 = vmatpush3.msra.mxu0 %v542_v48 }
 0x28c   :  { %882 = vmatprep.subr.mxu0 %v932_v1 }
 0x28d   :  { %883 = vmatpush3.msra.mxu0 %v541_v49 }
 0x28e   :  { %884 = vmatprep.subr.mxu0 %v932_v1 }
 0x28f   :  { %885 = vmatpush3.msra.mxu0 %v540_v50 }
 0x290   :  { %886 = vmatprep.subr.mxu0 %v932_v1 }
 0x291   :  { %887 = vmatpush3.msra.mxu0 %v539_v51 }
 0x292   :  { %888 = vmatprep.subr.mxu0 %v932_v1 }
 0x293   :  { %889 = vmatpush3.msra.mxu0 %v538_v52 }
 0x294   :  { %890 = vmatprep.subr.mxu0 %v932_v1 }
 0x295   :  { %891 = vmatpush3.msra.mxu0 %v537_v53 }
 0x296   :  { %892 = vmatprep.subr.mxu0 %v932_v1 }
 0x297   :  { %893 = vmatpush3.msra.mxu0 %v536_v54 }
 0x298   :  { %894 = vmatprep.subr.mxu0 %v932_v1 }
 0x299   :  { %895 = vmatpush3.msra.mxu0 %v535_v55 }
 0x29a   :  { %896 = vmatprep.subr.mxu0 %v932_v1 }
 0x29b   :  { %897 = vmatpush3.msra.mxu0 %v534_v61 }
 0x29c   :  { %898 = vmatprep.subr.mxu0 %v932_v1 }
 0x29d   :  { %899 = vmatpush3.msra.mxu0 %v533_v62 }
 0x29e   :  { %900 = vmatprep.subr.mxu0 %v932_v1 }
 0x29f   :  { %901 = vmatpush3.msra.mxu0 %v532_v63 }
 0x2a0   :  { %902 = vmatprep.subr.mxu0 %v932_v1  ;;  %v646_v1 = vld [vmem:[%s1478_s12] ss:$0 sm:$0xff] }
 0x2a1   :  { %903 = vmatpush3.msra.mxu0 %v531_v0 }
 0x342   :  { %v431_v57 = vpop.f32.mrf.mxu0 }
 0x343   :  { %v432_v58 = vadd.f32 %v644_v56, %v431_v57 }
 0x344   :  { %v836_v59 = vpop.f32.mrf.mxu0 }
 0x345   :  { %v435_v60 = vmax.f32 %v432_v58, 0.0 }
 0x347   :  { %870 = vmatmul.mubr.f32.vlgmr.msra.gmra.mxu1 %v435_v60 }
 0x407   :  { %v525_v3 = vpop.f32.mrf.mxu1 }
 0x408   :  { %v526_v4 = vadd.f32 %v645_v2, %v525_v3 }
 0x409   :  { %v871_v5 = vpop.f32.mrf.mxu1 }
 0x40a   :  { %v529_v6 = vadd.f32 %v526_v4, %v1374_v39 }
 0x40c   :  { %v530_v7 = vmax.f32 %v529_v6, 0.0 }
 0x40e   :  { %905 = vmatmul.mubr.f32.vlgmr.msra.gmra.mxu0 %v530_v7 }
 0x4ce   :  { %v620_v8 = vpop.f32.mrf.mxu0 }
 0x4cf   :  { %v621_v9 = vadd.f32 %v646_v1, %v620_v8 }
 0x4d0   :  { %v906_v10 = vpop.f32.mrf.mxu0 }
 0x4d1   :  { %v624_v11 = vmax.f32 %v621_v9, 0.0 }
 0x4d3   :  { %625 = vst [vmem:[#allocation2] sm:$0xff] %v624_v11 }
 0x4d4   :  { %921 = shalt.err (!%p918_p4)
}
 0x4d5   :  { %635 = dma.vmem_to_hbm [thread:$0]  %s633_s4, 128, %s1479_s13, [#allocation3]  }
 0x4d6   :  { %930 = dma.done.wait [#allocation3], 128  }
 0x4d7   :  { %931 = vsyncadd [#allocation3], 4294967168 }
 0x4d8   :  { %639 = vsyncpa [#allocation3], 1 }

</bundles_post_ra>
